<compile_context>
chip_gen: v6e
topology: v6e:2x2x1
jax: 0.10.0
libtpu: 0.0.40
codegen_flags: <defaults>
</compile_context>

<pallas_src>
import functools

import jax
import jax.numpy as jnp
from jax.experimental import pallas as pl
from jax.experimental.pallas import tpu as pltpu

# ----------------------------- configuration --------------------------------
N_LAYER = 4
HIDDEN_DIM = 32
INPUT_DIM = 16
NEG_SLOPE = 0.2      # LeakyReLU(0.2)
LANES = 128          # TPU lane width

# TODO(synk): nsgan loss branch (sigmoid + BCE) not implemented; gan_type='lsgan' assumed.
# TODO(synk): nn.Dropout not implemented; config.dropout=False (identity in eval anyway).


# ------------------------------ small helpers --------------------------------
def _cdiv(a, b):
    return (a + b - 1) // b


def _round_up(x, m):
    return ((x + m - 1) // m) * m


def _pick_packed_tile(n_packed, max_packed):
    """Tile size in packed rows.

    * If everything fits in one tile (<= max_packed), take a single step: the
      kernel is overhead-bound, so don't artificially split small batches.
    * Otherwise cap at ~n/4 (rounded to a multiple of 8) so the 'parallel'
      grid axis gives each of v7x's two TensorCores >= 2 steps to overlap
      DMA with compute; harmless on v5e/v6e (single TC).
    """
    max_packed = max(8, _round_up(max_packed, 8))
    if n_packed <= max_packed:
        return n_packed
    quarter = _round_up(_cdiv(n_packed, 4), 8)
    return max(8, min(max_packed, quarter))


def _pack_rows(x, pack):
    """[B, f] -> [ceil(B/pack), pack*f] (row-major pack of `pack` samples per row)."""
    b, f = x.shape
    b_pad = _round_up(b, pack)
    if b_pad != b:
        x = jnp.pad(x, ((0, b_pad - b), (0, 0)))
    return x.reshape(b_pad // pack, pack * f), b_pad


# ------------------------------- kernel bodies --------------------------------
def _mlp_body(x_ref, wb_refs, act_before):
    """Shared MLP hot path on the lane-packed layout.

    wb_refs = (w0, b0, w1, b1, ...) with block-diagonal (packed) weights.
    Weights may be bf16 (MXU-native with f32 accumulation); activations are
    carried in f32; LeakyReLU and bias adds stay f32 (v5e has no bf16 VPU).
    """
    h = x_ref[...].astype(jnp.float32)
    n_layers = len(wb_refs) // 2
    for li in range(n_layers):
        w_ref = wb_refs[2 * li]
        b_ref = wb_refs[2 * li + 1]
        if act_before[li]:
            h = jnp.where(h > 0, h, NEG_SLOPE * h)          # LeakyReLU(0.2), f32
        h = jnp.dot(h.astype(w_ref.dtype), w_ref[...],
                    preferred_element_type=jnp.float32)
        h = h + b_ref[...].astype(jnp.float32)
    return h


def _fwd_kernel(x_ref, *rest, act_before):
    """rest = (w0, b0, ..., wL, bL, out_ref); all lane-packed, output lane-dense."""
    o_ref = rest[-1]
    wb_refs = rest[:-1]
    h = _mlp_body(x_ref, wb_refs, act_before)
    o_ref[...] = h.astype(o_ref.dtype)


def _valid_row_mask(shape, tile_packed, pack, out_dim, total_rows):
    """Boolean mask over the packed output tile marking lanes whose original
    row index is < total_rows (pads / partial-block garbage are False)."""
    pr = (pl.program_id(0) * tile_packed
          + jax.lax.broadcasted_iota(jnp.int32, shape, 0))
    off = jax.lax.broadcasted_iota(jnp.int32, shape, 1) // out_dim
    return pr * pack + off < total_rows


def _gen_loss_kernel(x_ref, *rest, act_before, tile_packed, pack, out_dim,
                     total_rows, need_mask):
    """Fused forward + LSGAN generator-loss partial sum: sum((D(x)-1)^2)."""
    o_ref = rest[-1]
    wb_refs = rest[:-1]
    h = _mlp_body(x_ref, wb_refs, act_before)
    d = h - 1.0
    sq = d * d
    if need_mask:
        # select (not multiply) so NaN/Inf in garbage rows cannot leak in.
        sq = jnp.where(_valid_row_mask(h.shape, tile_packed, pack,
                                       out_dim, total_rows), sq, 0.0)
    psum = jnp.sum(sq, axis=1, keepdims=True)     # lane reduce    -> (tp, 1)
    psum = jnp.sum(psum, axis=0, keepdims=True)   # sublane reduce -> (1, 1)
    o_ref[0] = psum


def _dis_loss_kernel(xf_ref, xr_ref, *rest, act_before, tile_packed, pack,
                     out_dim, total_rows, need_mask):
    """Fused forward(fake)+forward(real) + LSGAN discriminator-loss partial sum:
    sum(D(fake)^2 + (D(real)-1)^2).  No concatenate: both inputs tiled per step."""
    o_ref = rest[-1]
    wb_refs = rest[:-1]
    hf = _mlp_body(xf_ref, wb_refs, act_before)
    hr = _mlp_body(xr_ref, wb_refs, act_before)
    dr = hr - 1.0
    sq = hf * hf + dr * dr
    if need_mask:
        sq = jnp.where(_valid_row_mask(hf.shape, tile_packed, pack,
                                       out_dim, total_rows), sq, 0.0)
    psum = jnp.sum(sq, axis=1, keepdims=True)
    psum = jnp.sum(psum, axis=0, keepdims=True)
    o_ref[0] = psum


# --------------------------- parameter preparation ----------------------------
def _fold_params(params):
    """Fold the last two affine layers (no activation between them in
    build_model).  Returns ([(W, b)...] in f32, act_before tuple)."""
    n = len(params)
    assert n >= 2
    w_pen, b_pen = params[n - 2]
    w_last, b_last = params[n - 1]
    w_f = jnp.dot(w_pen.astype(jnp.float32), w_last.astype(jnp.float32))
    b_f = (jnp.dot(b_pen.astype(jnp.float32), w_last.astype(jnp.float32))
           + b_last.astype(jnp.float32))
    fused = [(w.astype(jnp.float32), b.astype(jnp.float32))
             for (w, b) in params[: n - 2]]
    fused.append((w_f, b_f))
    # build_model: activation precedes every hidden Linear, never the first;
    # the fused layer keeps the activation that preceded layer n-2.
    act_before = tuple([False] + [True] * (n - 2))
    return fused, act_before


def _prepare_params_packed(params, pack, use_bf16):
    """Fold layers, then expand each (W, b) to block-diagonal / lane-tiled form
    so the MLP runs directly on the `pack`-rows-per-lane-row packed layout:
        W_bd = kron(I_pack, W)   (pack*in, pack*out)
        b_bd = tile(b, pack)     (1, pack*out)
    Weights cast to bf16 for the MXU; biases stay f32."""
    fused, act_before = _fold_params(params)
    eye = jnp.eye(pack, dtype=jnp.float32)
    flat = []
    for (w, b) in fused:
        wbd = jnp.kron(eye, w)
        wbd = wbd.astype(jnp.bfloat16) if use_bf16 else wbd
        flat += [wbd, jnp.tile(b, (1, pack))]
    return flat, act_before


def _param_in_specs(flat_params):
    specs = []
    for p in flat_params:
        # NOTE: ndim captured via default arg to avoid late-binding closure bug.
        specs.append(pl.BlockSpec(p.shape, lambda i, nd=p.ndim: (0,) * nd))
    return specs


# ------------------------------- forward wrapper ------------------------------
def discriminator_hsi_forward(x, params, *, batch_tile=8192, use_bf16=True):
    """x: [B, INPUT_DIM] float32.  params: list of (W:(in,out), b:(1,out))."""
    b_rows, f_in = x.shape
    assert LANES % f_in == 0, "lane-dense packing requires input_dim to divide 128"
    pack = LANES // f_in

    flat, act_before = _prepare_params_packed(params, pack, use_bf16)
    out_lanes = flat[-1].shape[-1]
    out_dim = out_lanes // pack

    xp, b_pad = _pack_rows(x, pack)
    n_packed, lanes_in = xp.shape
    tp = _pick_packed_tile(n_packed, max(8, batch_tile // pack))
    num_tiles = _cdiv(n_packed, tp)

    in_specs = [pl.BlockSpec((tp, lanes_in), lambda i: (i, 0))] + _param_in_specs(flat)
    out_spec = pl.BlockSpec((tp, out_lanes), lambda i: (i, 0))
    kernel = functools.partial(_fwd_kernel, act_before=act_before)

    out_packed = pl.pallas_call(
        kernel,
        out_shape=jax.ShapeDtypeStruct((n_packed, out_lanes), x.dtype),
        grid_spec=pltpu.PrefetchScalarGridSpec(
            num_scalar_prefetch=0,
            grid=(num_tiles,),
            in_specs=in_specs,
            out_specs=out_spec,
        ),
        compiler_params=pltpu.CompilerParams(
            dimension_semantics=("parallel",)),
    )(xp, *flat)

    out = out_packed.reshape(b_pad, out_dim)
    return out[:b_rows] if b_pad != b_rows else out


# --------------------------- fused LSGAN loss wrappers -------------------------
def _run_loss_call(kernel, xs_packed, flat, num_tiles, tp, lanes_in):
    in_specs = ([pl.BlockSpec((tp, lanes_in), lambda i: (i, 0)) for _ in xs_packed]
                + _param_in_specs(flat))
    out_spec = pl.BlockSpec((1, 1, 1), lambda i: (i, 0, 0))
    return pl.pallas_call(
        kernel,
        out_shape=jax.ShapeDtypeStruct((num_tiles, 1, 1), jnp.float32),
        grid_spec=pltpu.PrefetchScalarGridSpec(
            num_scalar_prefetch=0,
            grid=(num_tiles,),
            in_specs=in_specs,
            out_specs=out_spec,
        ),
        compiler_params=pltpu.CompilerParams(
            dimension_semantics=("parallel",)),
    )(*xs_packed, *flat)


def calc_gen_loss(x_fake, params, *, batch_tile=8192, use_bf16=True):
    """lsgan: mean((D(x_fake) - 1)^2), reduction fused into the kernel."""
    b_rows, f_in = x_fake.shape
    pack = LANES // f_in
    flat, act_before = _prepare_params_packed(params, pack, use_bf16)
    out_dim = flat[-1].shape[-1] // pack

    xp, _ = _pack_rows(x_fake, pack)
    n_packed, lanes_in = xp.shape
    tp = _pick_packed_tile(n_packed, max(8, batch_tile // pack))
    num_tiles = _cdiv(n_packed, tp)
    need_mask = (num_tiles * tp * pack != b_rows)

    kernel = functools.partial(
        _gen_loss_kernel, act_before=act_before, tile_packed=tp, pack=pack,
        out_dim=out_dim, total_rows=b_rows, need_mask=need_mask)
    partials = _run_loss_call(kernel, [xp], flat, num_tiles, tp, lanes_in)
    return jnp.sum(partials) / (b_rows * out_dim)


def calc_dis_loss(x_fake, x_real, params, *, batch_tile=8192, use_bf16=True):
    """lsgan: mean(D(x_fake)^2) + mean((D(x_real) - 1)^2), one fused pallas_call.
    Fake/real are separate inputs (no concatenate -> no extra HBM round trip)."""
    assert x_fake.shape == x_real.shape
    b_rows, f_in = x_fake.shape
    pack = LANES // f_in
    flat, act_before = _prepare_params_packed(params, pack, use_bf16)
    out_dim = flat[-1].shape[-1] // pack

    xf_p, _ = _pack_rows(x_fake, pack)
    xr_p, _ = _pack_rows(x_real, pack)
    n_packed, lanes_in = xf_p.shape
    tp = _pick_packed_tile(n_packed, max(8, batch_tile // pack))
    num_tiles = _cdiv(n_packed, tp)
    need_mask = (num_tiles * tp * pack != b_rows)

    kernel = functools.partial(
        _dis_loss_kernel, act_before=act_before, tile_packed=tp, pack=pack,
        out_dim=out_dim, total_rows=b_rows, need_mask=need_mask)
    partials = _run_loss_call(kernel, [xf_p, xr_p], flat, num_tiles, tp, lanes_in)
    # both means share the same element count B*out_dim
    return jnp.sum(partials) / (b_rows * out_dim)


# ------------------------------ parameter init --------------------------------
def init_params(key):
    """Deterministic init mimicking PyTorch nn.Linear default (U[-1/sqrt(fan_in), +])."""
    dims = [INPUT_DIM] + [HIDDEN_DIM] * (N_LAYER - 1) + [INPUT_DIM]
    params = []
    for li in range(len(dims) - 1):
        fan_in, fan_out = dims[li], dims[li + 1]
        key, kw, kb = jax.random.split(key, 3)
        bound = 1.0 / (fan_in ** 0.5)
        w = jax.random.uniform(kw, (fan_in, fan_out), jnp.float32, -bound, bound)
        b = jax.random.uniform(kb, (1, fan_out), jnp.float32, -bound, bound)
        params.append((w, b))
    return params


# --------------------------- references (plain JAX) ----------------------------
def reference_forward_f32(x, params):
    """Exact PyTorch-ordering f32 reference."""
    h = x.astype(jnp.float32)
    n = len(params)
    for li, (w, b) in enumerate(params):
        if 0 < li < n - 1:
            h = jnp.where(h > 0, h, NEG_SLOPE * h)
        h = h @ w + b
    return h


def reference_forward_matched(x, params, use_bf16=True):
    """Reference mirroring the kernel math (layer folding + bf16 MXU inputs,
    f32 accumulation) for tight numerical comparison."""
    fused, act_before = _fold_params(params)
    h = x.astype(jnp.float32)
    for li, (w, b) in enumerate(fused):
        if act_before[li]:
            h = jnp.where(h > 0, h, NEG_SLOPE * h)
        wd = w.astype(jnp.bfloat16) if use_bf16 else w
        h = jnp.dot(h.astype(wd.dtype), wd, preferred_element_type=jnp.float32) + b
    return h


# ---------------------------------- main ---------------------------------------
if __name__ == "__main__":
    key = jax.random.PRNGKey(0)
    key, kx, kx2, kx3, kf, kr = jax.random.split(key, 6)
    params = init_params(key)

    # 1) forward, pack-aligned batch (single tile)
    B = 16
    x = jax.random.normal(kx, (B, INPUT_DIM), jnp.float32)
    out = jax.block_until_ready(discriminator_hsi_forward(x, params))
    assert out.shape == (B, INPUT_DIM)
    assert jnp.allclose(out, reference_forward_matched(x, params),
                        atol=2e-3, rtol=2e-3), "mismatch vs matched (bf16) reference"
    assert jnp.allclose(out, reference_forward_f32(x, params),
                        atol=5e-2, rtol=5e-2), "mismatch vs f32 reference"

    # 2) forward, ragged batch (exercises wrapper-side pad + unpad)
    B2 = 20
    x2 = jax.random.normal(kx2, (B2, INPUT_DIM), jnp.float32)
    out2 = jax.block_until_ready(discriminator_hsi_forward(x2, params))
    assert out2.shape == (B2, INPUT_DIM)
    assert jnp.allclose(out2, reference_forward_matched(x2, params),
                        atol=2e-3, rtol=2e-3), "mismatch on ragged batch"

    # 3) forward, multi-tile grid with a partial last packed block
    B3 = 200
    x3 = jax.random.normal(kx3, (B3, INPUT_DIM), jnp.float32)
    out3 = jax.block_until_ready(discriminator_hsi_forward(x3, params, batch_tile=64))
    assert out3.shape == (B3, INPUT_DIM)
    assert jnp.allclose(out3, reference_forward_matched(x3, params),
                        atol=2e-3, rtol=2e-3), "mismatch on multi-tile batch"

    # 4) lsgan losses (fused in-kernel reductions, no concatenate for dis loss)
    x_fake = jax.random.normal(kf, (B, INPUT_DIM), jnp.float32)
    x_real = jax.random.normal(kr, (B, INPUT_DIM), jnp.float32)
    g_loss = jax.block_until_ready(calc_gen_loss(x_fake, params))
    d_loss = jax.block_until_ready(calc_dis_loss(x_fake, x_real, params))

    g_ref = jnp.mean((reference_forward_matched(x_fake, params) - 1.0) ** 2)
    d_ref = (jnp.mean(reference_forward_matched(x_fake, params) ** 2)
             + jnp.mean((reference_forward_matched(x_real, params) - 1.0) ** 2))
    assert jnp.allclose(g_loss, g_ref, atol=2e-3, rtol=2e-3), "gen loss mismatch"
    assert jnp.allclose(d_loss, d_ref, atol=2e-3, rtol=2e-3), "dis loss mismatch"

    # 5) lsgan losses with masking paths exercised (ragged + multi-tile)
    g_loss2 = jax.block_until_ready(calc_gen_loss(x2, params))
    g_ref2 = jnp.mean((reference_forward_matched(x2, params) - 1.0) ** 2)
    assert jnp.allclose(g_loss2, g_ref2, atol=2e-3, rtol=2e-3), "ragged gen loss mismatch"

    xf3 = x3
    xr3 = jax.random.normal(kr, (B3, INPUT_DIM), jnp.float32)
    d_loss3 = jax.block_until_ready(calc_dis_loss(xf3, xr3, params, batch_tile=64))
    d_ref3 = (jnp.mean(reference_forward_matched(xf3, params) ** 2)
              + jnp.mean((reference_forward_matched(xr3, params) - 1.0) ** 2))
    assert jnp.allclose(d_loss3, d_ref3, atol=2e-3, rtol=2e-3), "multi-tile dis loss mismatch"

    print("KERNEL_OK")
</pallas_src>

<mosaic_0001>
module attributes {stable_mosaic.version = 11 : i64} {
  func.func @_fwd_kernel(%arg0: i32, %arg1: memref<2x128xf32, #tpu.memory_space<vmem>>, %arg2: memref<128x256xbf16, #tpu.memory_space<vmem>>, %arg3: memref<1x256xf32, #tpu.memory_space<vmem>>, %arg4: memref<256x256xbf16, #tpu.memory_space<vmem>>, %arg5: memref<1x256xf32, #tpu.memory_space<vmem>>, %arg6: memref<256x128xbf16, #tpu.memory_space<vmem>>, %arg7: memref<1x128xf32, #tpu.memory_space<vmem>>, %arg8: memref<2x128xf32, #tpu.memory_space<vmem>>) attributes {dimension_semantics = [#tpu.dimension_semantics<parallel>], iteration_bounds = array<i64: 1>, scalar_prefetch = 0 : i64, scratch_operands = 0 : i64, tpu.core_type = #tpu.core_type<tc>, window_params = [{transform_indices = @transform_0, window_bounds = array<i64: 2, 128>}, {pipeline_mode = #tpu.pipeline_mode<synchronous>, transform_indices = @transform_1, window_bounds = array<i64: 128, 256>}, {pipeline_mode = #tpu.pipeline_mode<synchronous>, transform_indices = @transform_2, window_bounds = array<i64: 1, 256>}, {pipeline_mode = #tpu.pipeline_mode<synchronous>, transform_indices = @transform_3, window_bounds = array<i64: 256, 256>}, {pipeline_mode = #tpu.pipeline_mode<synchronous>, transform_indices = @transform_4, window_bounds = array<i64: 1, 256>}, {pipeline_mode = #tpu.pipeline_mode<synchronous>, transform_indices = @transform_5, window_bounds = array<i64: 256, 128>}, {pipeline_mode = #tpu.pipeline_mode<synchronous>, transform_indices = @transform_6, window_bounds = array<i64: 1, 128>}, {transform_indices = @transform_7, window_bounds = array<i64: 2, 128>}]} {
    %c0 = arith.constant 0 : index
    %c0_0 = arith.constant 0 : index
    %0 = vector.load %arg1[%c0, %c0_0] : memref<2x128xf32, #tpu.memory_space<vmem>>, vector<2x128xf32>
    %1 = arith.truncf %0 : vector<2x128xf32> to vector<2x128xbf16>
    %c0_1 = arith.constant 0 : index
    %c0_2 = arith.constant 0 : index
    %2 = vector.load %arg2[%c0_1, %c0_2] : memref<128x256xbf16, #tpu.memory_space<vmem>>, vector<128x256xbf16>
    %cst = arith.constant dense<0.000000e+00> : vector<2x256xf32>
    %3 = tpu.matmul %1, %2, %cst {dimension_numbers = #tpu.dot_dimension_numbers<[1], [0], [0], [1], [0, 0, 1, 1], [], []>} : vector<2x128xbf16>, vector<128x256xbf16>, vector<2x256xf32> -> vector<2x256xf32>
    %c0_3 = arith.constant 0 : index
    %c0_4 = arith.constant 0 : index
    %4 = vector.load %arg3[%c0_3, %c0_4] : memref<1x256xf32, #tpu.memory_space<vmem>>, vector<1x256xf32>
    %5 = vector.broadcast %4 : vector<1x256xf32> to vector<2x256xf32>
    %6 = arith.addf %3, %5 : vector<2x256xf32>
    %cst_5 = arith.constant 0.000000e+00 : f32
    %7 = vector.broadcast %cst_5 : f32 to vector<2x256xf32>
    %8 = arith.cmpf ogt, %6, %7 : vector<2x256xf32>
    %cst_6 = arith.constant 2.000000e-01 : f32
    %9 = vector.broadcast %cst_6 : f32 to vector<2x256xf32>
    %10 = arith.mulf %9, %6 : vector<2x256xf32>
    %11 = arith.select %8, %6, %10 : vector<2x256xi1>, vector<2x256xf32>
    %12 = arith.truncf %11 : vector<2x256xf32> to vector<2x256xbf16>
    %c0_7 = arith.constant 0 : index
    %c0_8 = arith.constant 0 : index
    %13 = vector.load %arg4[%c0_7, %c0_8] : memref<256x256xbf16, #tpu.memory_space<vmem>>, vector<256x256xbf16>
    %cst_9 = arith.constant dense<0.000000e+00> : vector<2x256xf32>
    %14 = tpu.matmul %12, %13, %cst_9 {dimension_numbers = #tpu.dot_dimension_numbers<[1], [0], [0], [1], [0, 0, 1, 1], [], []>} : vector<2x256xbf16>, vector<256x256xbf16>, vector<2x256xf32> -> vector<2x256xf32>
    %c0_10 = arith.constant 0 : index
    %c0_11 = arith.constant 0 : index
    %15 = vector.load %arg5[%c0_10, %c0_11] : memref<1x256xf32, #tpu.memory_space<vmem>>, vector<1x256xf32>
    %16 = vector.broadcast %15 : vector<1x256xf32> to vector<2x256xf32>
    %17 = arith.addf %14, %16 : vector<2x256xf32>
    %cst_12 = arith.constant 0.000000e+00 : f32
    %18 = vector.broadcast %cst_12 : f32 to vector<2x256xf32>
    %19 = arith.cmpf ogt, %17, %18 : vector<2x256xf32>
    %cst_13 = arith.constant 2.000000e-01 : f32
    %20 = vector.broadcast %cst_13 : f32 to vector<2x256xf32>
    %21 = arith.mulf %20, %17 : vector<2x256xf32>
    %22 = arith.select %19, %17, %21 : vector<2x256xi1>, vector<2x256xf32>
    %23 = arith.truncf %22 : vector<2x256xf32> to vector<2x256xbf16>
    %c0_14 = arith.constant 0 : index
    %c0_15 = arith.constant 0 : index
    %24 = vector.load %arg6[%c0_14, %c0_15] : memref<256x128xbf16, #tpu.memory_space<vmem>>, vector<256x128xbf16>
    %cst_16 = arith.constant dense<0.000000e+00> : vector<2x128xf32>
    %25 = tpu.matmul %23, %24, %cst_16 {dimension_numbers = #tpu.dot_dimension_numbers<[1], [0], [0], [1], [0, 0, 1, 1], [], []>} : vector<2x256xbf16>, vector<256x128xbf16>, vector<2x128xf32> -> vector<2x128xf32>
    %c0_17 = arith.constant 0 : index
    %c0_18 = arith.constant 0 : index
    %26 = vector.load %arg7[%c0_17, %c0_18] : memref<1x128xf32, #tpu.memory_space<vmem>>, vector<1x128xf32>
    %27 = vector.broadcast %26 : vector<1x128xf32> to vector<2x128xf32>
    %28 = arith.addf %25, %27 : vector<2x128xf32>
    %c0_19 = arith.constant 0 : index
    %c0_20 = arith.constant 0 : index
    %29 = vector.load %arg8[%c0_19, %c0_20] : memref<2x128xf32, #tpu.memory_space<vmem>>, vector<2x128xf32>
    tpu.vector_store %arg8[%c0_19, %c0_20], %28 {strides = array<i32>} : memref<2x128xf32, #tpu.memory_space<vmem>>, vector<2x128xf32>,
    return
  }
  func.func @transform_0(%arg0: i32) -> (i32, i32) {
    %c0_i32 = arith.constant 0 : i32
    %c0_i32_0 = arith.constant 0 : i32
    return %arg0, %c0_i32 : i32, i32
  }
  func.func @transform_1(%arg0: i32) -> (i32, i32) {
    %c0_i32 = arith.constant 0 : i32
    %c0_i32_0 = arith.constant 0 : i32
    %c0_i32_1 = arith.constant 0 : i32
    return %c0_i32, %c0_i32_0 : i32, i32
  }
  func.func @transform_2(%arg0: i32) -> (i32, i32) {
    %c0_i32 = arith.constant 0 : i32
    %c0_i32_0 = arith.constant 0 : i32
    %c0_i32_1 = arith.constant 0 : i32
    return %c0_i32, %c0_i32_0 : i32, i32
  }
  func.func @transform_3(%arg0: i32) -> (i32, i32) {
    %c0_i32 = arith.constant 0 : i32
    %c0_i32_0 = arith.constant 0 : i32
    %c0_i32_1 = arith.constant 0 : i32
    return %c0_i32, %c0_i32_0 : i32, i32
  }
  func.func @transform_4(%arg0: i32) -> (i32, i32) {
    %c0_i32 = arith.constant 0 : i32
    %c0_i32_0 = arith.constant 0 : i32
    %c0_i32_1 = arith.constant 0 : i32
    return %c0_i32, %c0_i32_0 : i32, i32
  }
  func.func @transform_5(%arg0: i32) -> (i32, i32) {
    %c0_i32 = arith.constant 0 : i32
    %c0_i32_0 = arith.constant 0 : i32
    %c0_i32_1 = arith.constant 0 : i32
    return %c0_i32, %c0_i32_0 : i32, i32
  }
  func.func @transform_6(%arg0: i32) -> (i32, i32) {
    %c0_i32 = arith.constant 0 : i32
    %c0_i32_0 = arith.constant 0 : i32
    %c0_i32_1 = arith.constant 0 : i32
    return %c0_i32, %c0_i32_0 : i32, i32
  }
  func.func @transform_7(%arg0: i32) -> (i32, i32) {
    %c0_i32 = arith.constant 0 : i32
    %c0_i32_0 = arith.constant 0 : i32
    return %arg0, %c0_i32 : i32, i32
  }
}

</mosaic_0001>

<bundles_post_ra>
// kernel: tpu_custom_call.1
= control target key start
LH: loop header
LB: loop body
LE: loop exit
PB: predicated region body
PF: predicated region fallthrough
CT: control target
= control target key end

     0   :  { %12 = vsyncpa [#allocation3], 0  ;;  %s1053_s0 = inlined_call_operand.hbm [shape: f32[2,128], index: 0, kind: input, shape index: {}]   ;;  %s1054_s1 = inlined_call_operand.hbm [shape: bf16[128,256], index: 1, kind: input, shape index: {}]   ;;  %s1055_s2 = inlined_call_operand.vmem [shape: f32[1,256], index: 2, kind: input, shape index: {}]   ;;  %s1056_s3 = inlined_call_operand.hbm [shape: bf16[256,256], index: 3, kind: input, shape index: {}]   ;;  %s1057_s4 = inlined_call_operand.vmem [shape: f32[1,256], index: 4, kind: input, shape index: {}]   ;;  %s1058_s5 = inlined_call_operand.hbm [shape: bf16[256,128], index: 5, kind: input, shape index: {}]   ;;  %s1059_s6 = inlined_call_operand.vmem [shape: f32[1,128], index: 6, kind: input, shape index: {}]   ;;  %s1060_s7 = inlined_call_operand.hbm [shape: f32[2,128], index: 7, kind: output, shape index: {}]  }
   0x1   :  { %13 = vsyncpa [#allocation6], 0 }
   0x2   :  { %14 = vsyncpa [#allocation9], 0 }
   0x3   :  { %15 = vsyncpa [#allocation4], 0  ;;  %s979_s24 = smov [#allocation5]  }
   0x4   :  { %s31_s25 = sshll.u32 %s979_s24, 4  ;;  %s32_s25 = int_to_ptr.vmem [resolvable:$true] %s31_s25 }
   0x5   :  { %s879_s26 = scalar_lea.vmem %s32_s25, 2048  ;;  %p884_p1 = scmp.lt.s32.totalorder %s32_s25, %s32_s25 }
   0x6   :  { %p880_p0 = scmp.ne.s32.totalorder %s32_s25, %s879_s26  ;;  %p885_p2 = scmp.lt.s32.totalorder %s879_s26, %s879_s26 }
   0x8   :  { %p886_p3 = por %p885_p2, %p884_p1 }
   0xa   :  { %p887_p4 = pnand %p886_p3, %p880_p0 }
   0xc   :  { %890 = shalt.err (!%p887_p4)
}
   0xd   :  { %s980_s27 = smov 128   ;;  %s981_s28 = smov 8  }
   0xe   :  { %37 = dma.hbm_to_vmem [thread:$0]  %s1054_s1, 2048, %s32_s25, [#allocation6], %s980_s27, %s980_s27, %s981_s28  }
   0xf   :  { %s982_s8 = smov [#allocation2]   ;;  %s983_s10 = smov [#allocation7]  }
  0x10   :  { %s22_s9 = sshll.u32 %s982_s8, 4  ;;  %s45_s11 = sshll.u32 %s983_s10, 4  ;;  %s23_s9 = int_to_ptr.vmem [resolvable:$true] %s22_s9  ;;  %s46_s11 = int_to_ptr.vmem [resolvable:$true] %s45_s11 }
  0x11   :  { %s899_s12 = scalar_lea.vmem %s23_s9, 32  ;;  %p904_p6 = scmp.lt.s32.totalorder %s23_s9, %s23_s9 }
  0x12   :  { %p900_p5 = scmp.ne.s32.totalorder %s23_s9, %s899_s12  ;;  %p905_p7 = scmp.lt.s32.totalorder %s899_s12, %s899_s12 }
  0x14   :  { %p906_p8 = por %p905_p7, %p904_p6 }
  0x16   :  { %p907_p9 = pnand %p906_p8, %p900_p5 }
  0x18   :  { %910 = shalt.err (!%p907_p9)
}
  0x19   :  { %25 = dma.hbm_to_vmem [thread:$0]  %s1053_s0, 32, %s23_s9, [#allocation3]  }
  0x1a   :  { %s919_s15 = scalar_lea.vmem %s46_s11, 4096  ;;  %p924_p11 = scmp.lt.s32.totalorder %s46_s11, %s46_s11 }
  0x1b   :  { %p920_p10 = scmp.ne.s32.totalorder %s46_s11, %s919_s15  ;;  %p925_p12 = scmp.lt.s32.totalorder %s919_s15, %s919_s15 }
  0x1d   :  { %p926_p13 = por %p925_p12, %p924_p11 }
  0x1f   :  { %p927_p0 = pnand %p926_p13, %p920_p10 }
  0x21   :  { %930 = shalt.err (!%p927_p0)
}
  0x22   :  { %51 = dma.hbm_to_vmem [thread:$0]  %s1056_s3, 4096, %s46_s11, [#allocation6], %s980_s27, %s980_s27, %s981_s28  }
  0x23   :  { %s984_s17 = smov [#allocation8]  }
  0x24   :  { %s59_s18 = sshll.u32 %s984_s17, 4  ;;  %s60_s18 = int_to_ptr.vmem [resolvable:$true] %s59_s18 }
  0x25   :  { %s939_s19 = scalar_lea.vmem %s60_s18, 2048  ;;  %p944_p2 = scmp.lt.s32.totalorder %s60_s18, %s60_s18 }
  0x26   :  { %p940_p1 = scmp.ne.s32.totalorder %s60_s18, %s939_s19  ;;  %p945_p3 = scmp.lt.s32.totalorder %s939_s19, %s939_s19 }
  0x28   :  { %p946_p4 = por %p945_p3, %p944_p2 }
  0x2a   :  { %p947_p5 = pnand %p946_p4, %p940_p1 }
  0x2c   :  { %950 = shalt.err (!%p947_p5)
}
  0x2d   :  { %s985_s0 = smov 64   ;;  %s986_s20 = smov 4  }
  0x2e   :  { %65 = dma.hbm_to_vmem [thread:$0]  %s1058_s5, 2048, %s60_s18, [#allocation9], %s985_s0, %s985_s0, %s986_s20  }
  0x2f   :  { %971 = dma.done.wait [#allocation3], 32  }
  0x30   :  { %972 = vsyncadd [#allocation3], 4294967264 }
  0x31   :  { %973 = dma.done.wait [#allocation6], 6144  }
  0x32   :  { %974 = vsyncadd [#allocation6], 4294961152 }
  0x33   :  { %975 = dma.done.wait [#allocation9], 2048  }
  0x34   :  { %976 = vsyncadd [#allocation9], 4294965248  ;;  %v987_v0 = vmov 0   ;;  %v783_v1 = vld [vmem:[#allocation5 + $0x74] ss:$8 sps:$4 sm:$0xff]   ;;  %v859_v55 = vld [vmem:[#allocation8 + $0x68] sm:$0xff]   ;;  %v101_v62 = vlaneseq }
  0x35   :  { %223 = vmatprep.mubr.bf16.mxu0 %v987_v0  ;;  %v785_v2 = vld [vmem:[#allocation5 + $0x70] ss:$8 sps:$4 sm:$0xff]   ;;  %191 = vmatprep.subr.bf16.mxu0 %v783_v1  ;;  %v786_v3 = vld [vmem:[#allocation5 + $0x64] ss:$8 sps:$4 sm:$0xff]   ;;  %v788_v4 = vld [vmem:[#allocation5 + $0x60] ss:$8 sps:$4 sm:$0xff]  }
  0x36   :  { %192 = vmatpush1.bf16.msra.mxu0 %v785_v2  ;;  %v789_v5 = vld [vmem:[#allocation5 + $0x54] ss:$8 sps:$4 sm:$0xff]   ;;  %v791_v6 = vld [vmem:[#allocation5 + $0x50] ss:$8 sps:$4 sm:$0xff]   ;;  %v792_v7 = vld [vmem:[#allocation5 + $0x44] ss:$8 sps:$4 sm:$0xff]  }
  0x37   :  { %193 = vmatprep.subr.bf16.mxu0 %v786_v3  ;;  %v794_v8 = vld [vmem:[#allocation5 + $0x40] ss:$8 sps:$4 sm:$0xff]   ;;  %v795_v9 = vld [vmem:[#allocation5 + $0x34] ss:$8 sps:$4 sm:$0xff]   ;;  %v809_v11 = vld [vmem:[#allocation7 + $0x70] ss:$8 sps:$4 sm:$0xff]  }
  0x38   :  { %v807_v10 = vld [vmem:[#allocation7 + $0x74] ss:$8 sps:$4 sm:$0xff]   ;;  %v810_v12 = vld [vmem:[#allocation7 + $0x64] ss:$8 sps:$4 sm:$0xff]   ;;  %v797_v13 = vld [vmem:[#allocation5 + $0x30] ss:$8 sps:$4 sm:$0xff]  }
  0x39   :  { %444 = vmatprep.subr.bf16.mxu1 %v807_v10  ;;  %v812_v14 = vld [vmem:[#allocation7 + $0x60] ss:$8 sps:$4 sm:$0xff]   ;;  %v813_v15 = vld [vmem:[#allocation7 + $0x54] ss:$8 sps:$4 sm:$0xff]   ;;  %v798_v16 = vld [vmem:[#allocation5 + $0x24] ss:$8 sps:$4 sm:$0xff]  }
  0x3a   :  { %194 = vmatpush1.bf16.msra.mxu0 %v788_v4  ;;  %445 = vmatpush1.bf16.msra.mxu1 %v809_v11  ;;  %v800_v17 = vld [vmem:[#allocation5 + $0x20] ss:$8 sps:$4 sm:$0xff]   ;;  %v815_v18 = vld [vmem:[#allocation7 + $0x50] ss:$8 sps:$4 sm:$0xff]   ;;  %v816_v19 = vld [vmem:[#allocation7 + $0x44] ss:$8 sps:$4 sm:$0xff]  }
  0x3b   :  { %195 = vmatprep.subr.bf16.mxu0 %v789_v5  ;;  %446 = vmatprep.subr.bf16.mxu1 %v810_v12  ;;  %v801_v20 = vld [vmem:[#allocation5 + $0x14] ss:$8 sps:$4 sm:$0xff]   ;;  %v803_v21 = vld [vmem:[#allocation5 + $0x10] ss:$8 sps:$4 sm:$0xff]   ;;  %v818_v22 = vld [vmem:[#allocation7 + $0x40] ss:$8 sps:$4 sm:$0xff]  }
  0x3c   :  { %v819_v23 = vld [vmem:[#allocation7 + $0x34] ss:$8 sps:$4 sm:$0xff]   ;;  %v804_v24 = vld [vmem:[#allocation5 + $0x4] ss:$8 sps:$4 sm:$0xff]   ;;  %v806_v25 = vld [vmem:[#allocation5] ss:$8 sps:$4 sm:$0xff]  }
  0x3d   :  { %v81_v26 = vld [vmem:[#allocation2] sm:$0x3]  ;;  %v821_v27 = vld [vmem:[#allocation7 + $0x30] ss:$8 sps:$4 sm:$0xff]   ;;  %v822_v28 = vld [vmem:[#allocation7 + $0x24] ss:$8 sps:$4 sm:$0xff]  }
  0x3e   :  { %196 = vmatpush1.bf16.msra.mxu0 %v791_v6  ;;  %447 = vmatpush1.bf16.msra.mxu1 %v812_v14  ;;  %v824_v29 = vld [vmem:[#allocation7 + $0x20] ss:$8 sps:$4 sm:$0xff]   ;;  %v825_v30 = vld [vmem:[#allocation7 + $0x14] ss:$8 sps:$4 sm:$0xff]   ;;  %v82_v31 = vpack.c.bf16 %v81_v26, %v81_v26  ;;  %v827_v32 = vld [vmem:[#allocation7 + $0x10] ss:$8 sps:$4 sm:$0xff]  }
  0x3f   :  { %197 = vmatprep.subr.bf16.mxu0 %v792_v7  ;;  %448 = vmatprep.subr.bf16.mxu1 %v813_v15  ;;  %v828_v33 = vld [vmem:[#allocation7 + $0x4] ss:$8 sps:$4 sm:$0xff]   ;;  %v830_v34 = vld [vmem:[#allocation7] ss:$8 sps:$4 sm:$0xff]   ;;  %v831_v35 = vld [vmem:[#allocation7 + $0xf4] ss:$8 sps:$4 sm:$0xff]  }
  0x40   :  { %v833_v36 = vld [vmem:[#allocation7 + $0xf0] ss:$8 sps:$4 sm:$0xff]   ;;  %v834_v37 = vld [vmem:[#allocation7 + $0xe4] ss:$8 sps:$4 sm:$0xff]   ;;  %v836_v38 = vld [vmem:[#allocation7 + $0xe0] ss:$8 sps:$4 sm:$0xff]  }
  0x41   :  { %v837_v39 = vld [vmem:[#allocation7 + $0xd4] ss:$8 sps:$4 sm:$0xff]   ;;  %v839_v40 = vld [vmem:[#allocation7 + $0xd0] ss:$8 sps:$4 sm:$0xff]   ;;  %v840_v41 = vld [vmem:[#allocation7 + $0xc4] ss:$8 sps:$4 sm:$0xff]  }
  0x42   :  { %198 = vmatpush1.bf16.msra.mxu0 %v794_v8  ;;  %449 = vmatpush1.bf16.msra.mxu1 %v815_v18  ;;  %v842_v42 = vld [vmem:[#allocation7 + $0xc0] ss:$8 sps:$4 sm:$0xff]   ;;  %v843_v43 = vld [vmem:[#allocation7 + $0xb4] ss:$8 sps:$4 sm:$0xff]   ;;  %v845_v44 = vld [vmem:[#allocation7 + $0xb0] ss:$8 sps:$4 sm:$0xff]  }
  0x43   :  { %199 = vmatprep.subr.bf16.mxu0 %v795_v9  ;;  %450 = vmatprep.subr.bf16.mxu1 %v816_v19  ;;  %v846_v45 = vld [vmem:[#allocation7 + $0xa4] ss:$8 sps:$4 sm:$0xff]   ;;  %v848_v46 = vld [vmem:[#allocation7 + $0xa0] ss:$8 sps:$4 sm:$0xff]   ;;  %v849_v47 = vld [vmem:[#allocation7 + $0x94] ss:$8 sps:$4 sm:$0xff]  }
  0x44   :  { %v851_v48 = vld [vmem:[#allocation7 + $0x90] ss:$8 sps:$4 sm:$0xff]   ;;  %v852_v49 = vld [vmem:[#allocation7 + $0x84] ss:$8 sps:$4 sm:$0xff]   ;;  %v854_v50 = vld [vmem:[#allocation7 + $0x80] ss:$8 sps:$4 sm:$0xff]  }
  0x45   :  { %v855_v51 = vld [vmem:[#allocation8 + $0x78] sm:$0xff]   ;;  %v857_v53 = vld [vmem:[#allocation8 + $0x70] sm:$0xff]   ;;  %v860_v56 = vld [vmem:[#allocation8 + $0x28] sm:$0xff]   ;;  %v102_v63 = vshrl.u32 %v101_v62, 7  ;;  %s988_s25 = smov [#allocation10]  }
  0x46   :  { %200 = vmatpush1.bf16.msra.mxu0 %v797_v13  ;;  %451 = vmatpush1.bf16.msra.mxu1 %v818_v22  ;;  %v856_v52 = vld [vmem:[#allocation8 + $0x38] sm:$0xff]   ;;  %v858_v54 = vld [vmem:[#allocation8 + $0x30] sm:$0xff]   ;;  %v861_v57 = vld [vmem:[#allocation8 + $0x60] sm:$0xff]   ;;  %s675_s26 = sshll.u32 %s988_s25, 4  ;;  %s676_s26 = int_to_ptr.vmem [resolvable:$true] %s675_s26 }
  0x47   :  { %201 = vmatprep.subr.bf16.mxu0 %v798_v16  ;;  %452 = vmatprep.subr.bf16.mxu1 %v819_v23  ;;  %v862_v58 = vld [vmem:[#allocation8 + $0x20] sm:$0xff]   ;;  %v863_v59 = vld [vmem:[#allocation8 + $0x58] sm:$0xff]   ;;  %v865_v61 = vld [vmem:[#allocation8 + $0x50] sm:$0xff]   ;;  %v103_v0 = vsub.s32 0, %v102_v63  ;;  %v107_v2 = vsub.s32 1, %v102_v63  ;;  %s951_s27 = scalar_lea.vmem %s676_s26, 32  ;;  %p956_p7 = scmp.lt.s32.totalorder %s676_s26, %s676_s26 }
  0x48   :  { %v864_v60 = vld [vmem:[#allocation8 + $0x18] sm:$0xff]   ;;  %v867_v18 = vld [vmem:[#allocation8 + $0x48] sm:$0xff]   ;;  %p952_p6 = scmp.ne.s32.totalorder %s676_s26, %s951_s27  ;;  %p957_p8 = scmp.lt.s32.totalorder %s951_s27, %s951_s27 }
  0x49   :  { %v99_v1 = vld [vmem:[%s1055_s2] sm:$0x3]  ;;  %v868_v19 = vld [vmem:[#allocation8 + $0x8] sm:$0xff]  }
  0x4a   :  { %202 = vmatpush1.bf16.msra.mxu0 %v800_v17  ;;  %453 = vmatpush1.bf16.msra.mxu1 %v821_v27  ;;  %v104_v3 = vrot.slane %v99_v1, %v103_v0  ;;  %v108_v4 = vrot.slane %v99_v1, %v107_v2  ;;  %v866_v17 = vld [vmem:[#allocation8 + $0x10] sm:$0xff]   ;;  %v272_v22 = vld [vmem:[%s1057_s4] sm:$0x3]  ;;  %p958_p9 = por %p957_p8, %p956_p7 }
  0x4b   :  { %203 = vmatprep.subr.bf16.mxu0 %v801_v20  ;;  %454 = vmatprep.subr.bf16.mxu1 %v822_v28  ;;  %v869_v20 = vld [vmem:[#allocation8 + $0x40] sm:$0xff]   ;;  %v277_v23 = vrot.slane %v272_v22, %v103_v0 }
  0x4c   :  { %p959_p10 = pnand %p958_p9, %p952_p6 }
  0x4e   :  { %204 = vmatpush1.bf16.msra.mxu0 %v803_v21  ;;  %455 = vmatpush1.bf16.msra.mxu1 %v824_v29  ;;  %v870_v21 = vld [vmem:[#allocation8] sm:$0xff]  }
  0x4f   :  { %205 = vmatprep.subr.bf16.mxu0 %v804_v24  ;;  %456 = vmatprep.subr.bf16.mxu1 %v825_v30  ;;  %v281_v24 = vrot.slane %v272_v22, %v107_v2 }
  0x52   :  { %206 = vmatpush1.bf16.msra.mxu0 %v806_v25  ;;  %457 = vmatpush1.bf16.msra.mxu1 %v827_v32 }
  0x53   :  { %458 = vmatprep.subr.bf16.mxu1 %v828_v33  ;;  %751 = vmatprep.subr.bf16.mxu0 %v855_v51 }
  0x55   :  { %224 = vmatmul.mubr.bf16.vlgmr.msra.gmra.mxu0 %v82_v31 }
  0x56   :  { %459 = vmatpush1.bf16.msra.mxu1 %v830_v34  ;;  %752 = vmatpush3.bf16.msra.mxu0 %v856_v52 }
  0x57   :  { %460 = vmatprep.subr.bf16.mxu1 %v831_v35  ;;  %753 = vmatprep.subr.bf16.mxu0 %v857_v53 }
  0x5a   :  { %461 = vmatpush2.bf16.msra.mxu1 %v833_v36  ;;  %754 = vmatpush3.bf16.msra.mxu0 %v858_v54 }
  0x5b   :  { %462 = vmatprep.subr.bf16.mxu1 %v834_v37  ;;  %755 = vmatprep.subr.bf16.mxu0 %v859_v55 }
  0x5e   :  { %463 = vmatpush2.bf16.msra.mxu1 %v836_v38  ;;  %756 = vmatpush3.bf16.msra.mxu0 %v860_v56  ;;  %v734_v38 = vld [vmem:[%s1059_s6] ss:$0 sm:$0xff] }
  0x5f   :  { %464 = vmatprep.subr.bf16.mxu1 %v837_v39  ;;  %757 = vmatprep.subr.bf16.mxu0 %v861_v57 }
  0x62   :  { %465 = vmatpush2.bf16.msra.mxu1 %v839_v40  ;;  %758 = vmatpush3.bf16.msra.mxu0 %v862_v58 }
  0x63   :  { %466 = vmatprep.subr.bf16.mxu1 %v840_v41  ;;  %759 = vmatprep.subr.bf16.mxu0 %v863_v59 }
  0x66   :  { %467 = vmatpush2.bf16.msra.mxu1 %v842_v42  ;;  %760 = vmatpush3.bf16.msra.mxu0 %v864_v60 }
  0x67   :  { %468 = vmatprep.subr.bf16.mxu1 %v843_v43  ;;  %761 = vmatprep.subr.bf16.mxu0 %v865_v61 }
  0x6a   :  { %469 = vmatpush2.bf16.msra.mxu1 %v845_v44  ;;  %762 = vmatpush3.bf16.msra.mxu0 %v866_v17 }
  0x6b   :  { %470 = vmatprep.subr.bf16.mxu1 %v846_v45  ;;  %763 = vmatprep.subr.bf16.mxu0 %v867_v18 }
  0x6e   :  { %471 = vmatpush2.bf16.msra.mxu1 %v848_v46  ;;  %764 = vmatpush3.bf16.msra.mxu0 %v868_v19 }
  0x6f   :  { %472 = vmatprep.subr.bf16.mxu1 %v849_v47  ;;  %765 = vmatprep.subr.bf16.mxu0 %v869_v20 }
  0x72   :  { %473 = vmatpush2.bf16.msra.mxu1 %v851_v48  ;;  %766 = vmatpush3.bf16.msra.mxu0 %v870_v21 }
  0x73   :  { %474 = vmatprep.subr.bf16.mxu1 %v852_v49 }
  0x76   :  { %475 = vmatpush2.bf16.msra.mxu1 %v854_v50 }
 0x115   :  { %v225_v5 = vpop.f32.mrf.mxu0 }
 0x116   :  { %v226_v6 = vadd.f32 %v225_v5, %v104_v3 }
 0x117   :  { %v227_v7 = vpop.f32.mrf.mxu0 }
 0x118   :  { %vm232_vm0 = vcmp.gt.f32.partialorder %v226_v6, 0.0  ;;  %v234_v8 = vmul.f32 0.2, %v226_v6  ;;  %v228_v9 = vadd.f32 %v227_v7, %v108_v4 }
 0x119   :  { %v229_v10 = vpop.f32.mrf.mxu0 }
 0x11a   :  { %vm233_vm1 = vcmp.gt.f32.partialorder %v228_v9, 0.0  ;;  %v235_v11 = vmul.f32 0.2, %v228_v9  ;;  %v236_v13 = vsel %vm232_vm0, %v226_v6, %v234_v8 }
 0x11b   :  { %v230_v12 = vpop.f32.mrf.mxu0  ;;  %v238_v16 = vpack.c.bf16 %v236_v13, %v236_v13 }
 0x11c   :  { %v237_v14 = vsel %vm233_vm1, %v228_v9, %v235_v11 }
 0x11d   :  { %v239_v15 = vpack.c.bf16 %v237_v14, %v237_v14 }
 0x11f   :  { %476 = vmatprep.mubr.bf16.mxu1 %v239_v15 }
 0x120   :  { %477 = vmatmul.mubr.bf16.vlgmr.msra.gmra.mxu1 %v238_v16 }
 0x1e0   :  { %v478_v25 = vpop.f32.mrf.mxu1 }
 0x1e1   :  { %v479_v26 = vadd.f32 %v478_v25, %v277_v23 }
 0x1e2   :  { %v480_v27 = vpop.f32.mrf.mxu1 }
 0x1e3   :  { %vm485_vm2 = vcmp.gt.f32.partialorder %v479_v26, 0.0  ;;  %v487_v28 = vmul.f32 0.2, %v479_v26  ;;  %v481_v29 = vadd.f32 %v480_v27, %v281_v24 }
 0x1e4   :  { %v482_v30 = vpop.f32.mrf.mxu1 }
 0x1e5   :  { %vm486_vm3 = vcmp.gt.f32.partialorder %v481_v29, 0.0  ;;  %v488_v31 = vmul.f32 0.2, %v481_v29  ;;  %v489_v32 = vsel %vm485_vm2, %v479_v26, %v487_v28 }
 0x1e6   :  { %v483_v33 = vpop.f32.mrf.mxu1  ;;  %v491_v36 = vpack.c.bf16 %v489_v32, %v489_v32 }
 0x1e7   :  { %v490_v34 = vsel %vm486_vm3, %v481_v29, %v488_v31 }
 0x1e8   :  { %v492_v35 = vpack.c.bf16 %v490_v34, %v490_v34 }
 0x1ea   :  { %660 = vmatprep.mubr.bf16.mxu0 %v492_v35 }
 0x1eb   :  { %661 = vmatmul.mubr.bf16.vlgmr.msra.gmra.mxu0 %v491_v36 }
 0x2ab   :  { %v767_v37 = vpop.f32.mrf.mxu0 }
 0x2ad   :  { %v768_v39 = vpop.f32.mrf.mxu0 }
 0x2ae   :  { %v769_v40 = vadd.f32 %v768_v39, %v767_v37 }
 0x2af   :  { %v770_v41 = vpop.f32.mrf.mxu0 }
 0x2b0   :  { %v663_v42 = vadd.f32 %v769_v40, %v734_v38 }
 0x2b1   :  { %v771_v43 = vpop.f32.mrf.mxu0 }
 0x2b2   :  { %668 = vst [vmem:[#allocation10] sm:$0x3] %v663_v42 }
 0x2b3   :  { %962 = shalt.err (!%p959_p10)
}
 0x2b4   :  { %678 = dma.vmem_to_hbm [thread:$0]  %s676_s26, 32, %s1060_s7, [#allocation4]  }
 0x2b5   :  { %977 = dma.done.wait [#allocation4], 32  }
 0x2b6   :  { %978 = vsyncadd [#allocation4], 4294967264 }
 0x2b7   :  { %682 = vsyncpa [#allocation3], 1 }
 0x2b8   :  { %683 = vsyncpa [#allocation6], 1 }
 0x2b9   :  { %684 = vsyncpa [#allocation9], 1 }
 0x2ba   :  { %685 = vsyncpa [#allocation4], 1 }

</bundles_post_ra>
